<compile_context>
chip_gen: v6e
topology: v6e:2x2x1
jax: 0.10.0
libtpu: 0.0.40
codegen_flags: <defaults>
</compile_context>

<pallas_src>
import math
from functools import partial

import jax
import jax.numpy as jnp
from jax.experimental import pallas as pl
from jax.experimental.pallas import tpu as pltpu


def _round_up(x, m):
    return ((x + m - 1) // m) * m


# ---------------------------------------------------------------------------
# Fused Pallas kernel: conv + ReLU + FC1 + ReLU + FC2 + ReLU + FC3
# ---------------------------------------------------------------------------
def _convnet_kernel(patches_ref, wc_ref, bc_ref, w1x_ref, mask_ref, rsum_ref,
                    csum_ref, b1_ref, w2t_ref, b2_ref, w3t_ref, b3_ref,
                    out_ref, act_ref, *, nb, pp, ocp):
    # patches_ref: (1, CK2p, NB*P)  bf16  im2col patches, column = n*P + p
    # wc_ref:      (OCp, CK2p)      bf16  conv weight (rows oc, cols c*K*K+kh*K+kw)
    # bc_ref:      (OCp, 1)         f32
    # w1x_ref:     (P, OCp*H1)      f32   w1x[p, oc*H1+j] = w1[j, oc*P+p]
    # mask_ref:    (NB*OCp, OCp*H1) f32   1 where row-oc == column-group-oc
    # rsum_ref:    (NB, NB*OCp)     f32   sums the OCp rows of each sample
    # csum_ref:    (OCp*H1, H1)     f32   sums the OCp column groups
    # b1:(1,H1) w2t:(H1,H2) b2:(1,H2) w3t:(H2,NCp) b3:(1,NCp)
    # out_ref:     (NB, NCp)        f32
    # act_ref:     (NB*OCp, P)      f32 VMEM scratch (sample-major activations)

    # ---- conv: ONE lane-dense MXU matmul for the whole batch block ----------
    conv = jnp.dot(wc_ref[...], patches_ref[0],
                   preferred_element_type=jnp.float32)            # (OCp, NB*P)
    conv = jnp.maximum(conv + bc_ref[...], 0.0)                   # bias+ReLU slab

    # ---- regroup lanes (n*P + p) into sample-major rows (n*OCp + oc, p) -----
    # NB static slice+stores; each iteration keeps only 2-3 vregs live.
    for n in range(nb):
        act_ref[pl.ds(n * ocp, ocp), :] = conv[:, n * pp:(n + 1) * pp]

    # ---- FC1 on the MXU, batched over the whole block -----------------------
    #   u[n*OCp+oc, oc'*H1+j] = sum_p act[n,oc,p] * w1[j, oc'*P+p]
    # mask keeps oc'==oc, rsum folds the OCp rows of each sample, csum folds
    # the OCp column groups -> h1[n,j] = sum_{oc,p} act[n,oc,p]*w1[j, oc*P+p].
    u = jnp.dot(act_ref[...], w1x_ref[...],
                preferred_element_type=jnp.float32)               # (NB*OCp, OCp*H1)
    u = u * mask_ref[...]
    g = jnp.dot(rsum_ref[...], u, preferred_element_type=jnp.float32)   # (NB, OCp*H1)
    h = jnp.dot(g, csum_ref[...], preferred_element_type=jnp.float32)   # (NB, H1)
    h = jnp.maximum(h + b1_ref[...], 0.0)

    # ---- FC2 / FC3 batched across the block; single lane-dense store --------
    h = jnp.maximum(
        jnp.dot(h, w2t_ref[...], preferred_element_type=jnp.float32) + b2_ref[...],
        0.0)                                                      # (NB, H2)
    out_ref[...] = (jnp.dot(h, w3t_ref[...], preferred_element_type=jnp.float32)
                    + b3_ref[...])                                # (NB, NCp)


# ---------------------------------------------------------------------------
# Glue: im2col, trace-time weight prep, grid setup
# ---------------------------------------------------------------------------
def _im2col(x_nchw, K):
    # -> (N, C*K*K, OH*OW); row = c*K*K + kh*K + kw (matches OIHW weight
    # flatten), column = oh*OW + ow (matches PyTorch's post-conv Flatten order).
    N, C, H, W = x_nchw.shape
    OH, OW = H - K + 1, W - K + 1
    cols = [x_nchw[:, :, kh:kh + OH, kw:kw + OW]
            for kh in range(K) for kw in range(K)]       # each (N, C, OH, OW)
    p = jnp.stack(cols, axis=2)                          # (N, C, K*K, OH, OW)
    return p.reshape(N, C * K * K, OH * OW)


def convnet_forward(x, params):
    """x: (N, C, H, W) float32 -> logits (N, n_classes)."""
    w_conv, b_conv, w1, b1, w2, b2, w3, b3 = params
    N, C, H, W = x.shape
    OC, _, K, _ = w_conv.shape
    OH, OW = H - K + 1, W - K + 1
    P = OH * OW
    CK2 = C * K * K
    CK2p = _round_up(CK2, 128)      # conv contraction dim -> lane width
    OCp = _round_up(OC, 8)          # conv out-channels  -> sublane width
    H1, H2, NC = w1.shape[0], w2.shape[0], w3.shape[0]
    NCp = _round_up(NC, 128)        # lane-dense (unmasked) output store

    # Batch block size (per-step VMEM ~ NB * 37 KiB bf16 patches, double-buffered).
    NB = N if N <= 16 else 16
    Np = _round_up(N, NB)
    nblk = Np // NB

    # ---- trace-time constant prep (all tiny) ----
    wc = jnp.pad(w_conv.reshape(OC, CK2),
                 ((0, OCp - OC), (0, CK2p - CK2))).astype(jnp.bfloat16)
    bc = jnp.pad(b_conv.reshape(OC, 1), ((0, OCp - OC), (0, 0)))
    # fc1 weight with the Flatten permutation folded in:
    #   w1x[p, oc*H1 + j] = w1[j, oc*P + p]  (zero columns for padded oc)
    w1x = jnp.pad(w1.reshape(H1, OC, P).transpose(2, 1, 0),
                  ((0, 0), (0, OCp - OC), (0, 0))).reshape(P, OCp * H1)
    b1r = b1.reshape(1, H1)
    w2t = w2.T
    b2r = b2.reshape(1, H2)
    w3t = jnp.pad(w3.T, ((0, 0), (0, NCp - NC)))
    b3r = jnp.pad(b3.reshape(1, NC), ((0, 0), (0, NCp - NC)))

    # FC1 diagonal-select mask and row/column collapse matrices (static).
    row_oc = jnp.tile(jnp.arange(OCp), NB)                  # row r -> r % OCp
    col_oc = jnp.repeat(jnp.arange(OCp), H1)                # col c -> c // H1
    fc1_mask = (row_oc[:, None] == col_oc[None, :]).astype(jnp.float32)
    fc1_rsum = jnp.repeat(jnp.eye(NB, dtype=jnp.float32), OCp, axis=1)   # (NB, NB*OCp)
    fc1_csum = jnp.tile(jnp.eye(H1, dtype=jnp.float32), (OCp, 1))        # (OCp*H1, H1)

    # ---- patches: (nblk, CK2p, NB*P), column = n*P + p, bf16 ----
    patches = _im2col(x, K)                                          # (N, CK2, P)
    patches = jnp.pad(patches, ((0, Np - N), (0, CK2p - CK2), (0, 0)))
    patches = patches.reshape(nblk, NB, CK2p, P).transpose(0, 2, 1, 3)
    patches = patches.reshape(nblk, CK2p, NB * P).astype(jnp.bfloat16)

    kernel = partial(_convnet_kernel, nb=NB, pp=P, ocp=OCp)
    out = pl.pallas_call(
        kernel,
        out_shape=jax.ShapeDtypeStruct((Np, NCp), jnp.float32),
        grid_spec=pltpu.PrefetchScalarGridSpec(
            num_scalar_prefetch=0,
            grid=(nblk,),
            in_specs=[
                pl.BlockSpec((1, CK2p, NB * P), lambda i: (i, 0, 0)),   # patches
                pl.BlockSpec((OCp, CK2p), lambda i: (0, 0)),            # wc
                pl.BlockSpec((OCp, 1), lambda i: (0, 0)),               # bc
                pl.BlockSpec((P, OCp * H1), lambda i: (0, 0)),          # w1x
                pl.BlockSpec((NB * OCp, OCp * H1), lambda i: (0, 0)),   # fc1_mask
                pl.BlockSpec((NB, NB * OCp), lambda i: (0, 0)),         # fc1_rsum
                pl.BlockSpec((OCp * H1, H1), lambda i: (0, 0)),         # fc1_csum
                pl.BlockSpec((1, H1), lambda i: (0, 0)),                # b1
                pl.BlockSpec((H1, H2), lambda i: (0, 0)),               # w2t
                pl.BlockSpec((1, H2), lambda i: (0, 0)),                # b2
                pl.BlockSpec((H2, NCp), lambda i: (0, 0)),              # w3t
                pl.BlockSpec((1, NCp), lambda i: (0, 0)),               # b3
            ],
            out_specs=pl.BlockSpec((NB, NCp), lambda i: (i, 0)),
            scratch_shapes=[pltpu.VMEM((NB * OCp, P), jnp.float32)],
        ),
        compiler_params=pltpu.CompilerParams(
            dimension_semantics=("parallel",)),
    )(patches, wc, bc, w1x, fc1_mask, fc1_rsum, fc1_csum,
      b1r, w2t, b2r, w3t, b3r)

    return out[:N, :NC]


# ---------------------------------------------------------------------------
# Deterministic parameter init (PyTorch-style uniform(+-1/sqrt(fan_in)))
# ---------------------------------------------------------------------------
def init_params(key, in_channels, H, W, n_classes):
    K = 5
    OC = 6
    OH, OW = H - K + 1, W - K + 1
    flat_dim = OC * OH * OW

    def uni(k, shape, fan_in):
        bound = 1.0 / math.sqrt(fan_in)
        return jax.random.uniform(k, shape, jnp.float32, -bound, bound)

    ks = jax.random.split(key, 8)
    w_conv = uni(ks[0], (OC, in_channels, K, K), in_channels * K * K)
    b_conv = uni(ks[1], (OC,), in_channels * K * K)
    w1 = uni(ks[2], (16, flat_dim), flat_dim)
    b1 = uni(ks[3], (16,), flat_dim)
    w2 = uni(ks[4], (8, 16), 16)
    b2 = uni(ks[5], (8,), 16)
    w3 = uni(ks[6], (n_classes, 8), 8)
    b3 = uni(ks[7], (n_classes,), 8)
    return (w_conv, b_conv, w1, b1, w2, b2, w3, b3)


# ---------------------------------------------------------------------------
# Pure-JAX f32 reference (for correctness check)
# ---------------------------------------------------------------------------
def reference_forward(x, params):
    w_conv, b_conv, w1, b1, w2, b2, w3, b3 = params
    conv = jax.lax.conv_general_dilated(
        x, w_conv, window_strides=(1, 1), padding="VALID",
        dimension_numbers=("NCHW", "OIHW", "NCHW"))
    conv = jnp.maximum(conv + b_conv.reshape(1, -1, 1, 1), 0.0)
    feat = conv.reshape(x.shape[0], -1)
    h = jnp.maximum(feat @ w1.T + b1, 0.0)
    h = jnp.maximum(h @ w2.T + b2, 0.0)
    return h @ w3.T + b3


if __name__ == "__main__":
    key = jax.random.PRNGKey(0)
    k_x, k_p = jax.random.split(key)

    N, C, H, W = 2, 4, 16, 16
    n_classes = 3

    x = jax.random.normal(k_x, (N, C, H, W), jnp.float32)
    params = init_params(k_p, C, H, W, n_classes)

    fwd = jax.jit(convnet_forward)
    out = jax.block_until_ready(fwd(x, params))

    ref = reference_forward(x, params)
    assert out.shape == (N, n_classes)
    # bf16 patches / conv weight (f32 accumulation) -> slightly looser tolerance.
    assert jnp.allclose(out, ref, atol=2e-2, rtol=2e-2), "mismatch vs reference"

    print("KERNEL_OK")
</pallas_src>

<mosaic_0001>
module attributes {stable_mosaic.version = 11 : i64} {
  func.func @_convnet_kernel(%arg0: i32, %arg1: memref<1x128x288xbf16, #tpu.memory_space<vmem>>, %arg2: memref<8x128xbf16, #tpu.memory_space<vmem>>, %arg3: memref<8x1xf32, #tpu.memory_space<vmem>>, %arg4: memref<144x128xf32, #tpu.memory_space<vmem>>, %arg5: memref<16x128xf32, #tpu.memory_space<vmem>>, %arg6: memref<2x16xf32, #tpu.memory_space<vmem>>, %arg7: memref<128x16xf32, #tpu.memory_space<vmem>>, %arg8: memref<1x16xf32, #tpu.memory_space<vmem>>, %arg9: memref<16x8xf32, #tpu.memory_space<vmem>>, %arg10: memref<1x8xf32, #tpu.memory_space<vmem>>, %arg11: memref<8x128xf32, #tpu.memory_space<vmem>>, %arg12: memref<1x128xf32, #tpu.memory_space<vmem>>, %arg13: memref<2x128xf32, #tpu.memory_space<vmem>>, %arg14: memref<16x144xf32, #tpu.memory_space<vmem>>) attributes {dimension_semantics = [#tpu.dimension_semantics<parallel>], iteration_bounds = array<i64: 1>, scalar_prefetch = 0 : i64, scratch_operands = 1 : i64, tpu.core_type = #tpu.core_type<tc>, window_params = [{transform_indices = @transform_0, window_bounds = array<i64: 1, 128, 288>}, {pipeline_mode = #tpu.pipeline_mode<synchronous>, transform_indices = @transform_1, window_bounds = array<i64: 8, 128>}, {pipeline_mode = #tpu.pipeline_mode<synchronous>, transform_indices = @transform_2, window_bounds = array<i64: 8, 1>}, {pipeline_mode = #tpu.pipeline_mode<synchronous>, transform_indices = @transform_3, window_bounds = array<i64: 144, 128>}, {pipeline_mode = #tpu.pipeline_mode<synchronous>, transform_indices = @transform_4, window_bounds = array<i64: 16, 128>}, {pipeline_mode = #tpu.pipeline_mode<synchronous>, transform_indices = @transform_5, window_bounds = array<i64: 2, 16>}, {pipeline_mode = #tpu.pipeline_mode<synchronous>, transform_indices = @transform_6, window_bounds = array<i64: 128, 16>}, {pipeline_mode = #tpu.pipeline_mode<synchronous>, transform_indices = @transform_7, window_bounds = array<i64: 1, 16>}, {pipeline_mode = #tpu.pipeline_mode<synchronous>, transform_indices = @transform_8, window_bounds = array<i64: 16, 8>}, {pipeline_mode = #tpu.pipeline_mode<synchronous>, transform_indices = @transform_9, window_bounds = array<i64: 1, 8>}, {pipeline_mode = #tpu.pipeline_mode<synchronous>, transform_indices = @transform_10, window_bounds = array<i64: 8, 128>}, {pipeline_mode = #tpu.pipeline_mode<synchronous>, transform_indices = @transform_11, window_bounds = array<i64: 1, 128>}, {transform_indices = @transform_12, window_bounds = array<i64: 2, 128>}]} {
    %c0 = arith.constant 0 : index
    %c0_0 = arith.constant 0 : index
    %0 = vector.load %arg2[%c0, %c0_0] : memref<8x128xbf16, #tpu.memory_space<vmem>>, vector<8x128xbf16>
    %c0_1 = arith.constant 0 : index
    %c0_2 = arith.constant 0 : index
    %c0_3 = arith.constant 0 : index
    %1 = vector.load %arg1[%c0_1, %c0_2, %c0_3] : memref<1x128x288xbf16, #tpu.memory_space<vmem>>, vector<1x128x288xbf16>
    %2 = vector.shape_cast %1 : vector<1x128x288xbf16> to vector<128x288xbf16>
    %cst = arith.constant dense<0.000000e+00> : vector<8x288xf32>
    %3 = tpu.matmul %0, %2, %cst {dimension_numbers = #tpu.dot_dimension_numbers<[1], [0], [0], [1], [0, 0, 1, 1], [], []>} : vector<8x128xbf16>, vector<128x288xbf16>, vector<8x288xf32> -> vector<8x288xf32>
    %c0_4 = arith.constant 0 : index
    %c0_5 = arith.constant 0 : index
    %4 = vector.load %arg3[%c0_4, %c0_5] : memref<8x1xf32, #tpu.memory_space<vmem>>, vector<8x1xf32>
    %5 = vector.broadcast %4 : vector<8x1xf32> to vector<8x288xf32>
    %6 = arith.addf %3, %5 : vector<8x288xf32>
    %cst_6 = arith.constant 0.000000e+00 : f32
    %7 = vector.broadcast %cst_6 : f32 to vector<8x288xf32>
    %8 = arith.maximumf %6, %7 : vector<8x288xf32>
    %9 = vector.extract_strided_slice %8 {offsets = [0, 0], sizes = [8, 144], strides = [1, 1]} : vector<8x288xf32> to vector<8x144xf32>
    %c0_7 = arith.constant 0 : index
    %c0_8 = arith.constant 0 : index
    %10 = vector.load %arg14[%c0_7, %c0_8] : memref<16x144xf32, #tpu.memory_space<vmem>>, vector<8x144xf32>
    tpu.vector_store %arg14[%c0_7, %c0_8], %9 {strides = array<i32>} : memref<16x144xf32, #tpu.memory_space<vmem>>, vector<8x144xf32>,
    %11 = vector.extract_strided_slice %8 {offsets = [0, 144], sizes = [8, 144], strides = [1, 1]} : vector<8x288xf32> to vector<8x144xf32>
    %c8 = arith.constant 8 : index
    %c0_9 = arith.constant 0 : index
    %12 = vector.load %arg14[%c8, %c0_9] : memref<16x144xf32, #tpu.memory_space<vmem>>, vector<8x144xf32>
    tpu.vector_store %arg14[%c8, %c0_9], %11 {strides = array<i32>} : memref<16x144xf32, #tpu.memory_space<vmem>>, vector<8x144xf32>,
    %c0_10 = arith.constant 0 : index
    %c0_11 = arith.constant 0 : index
    %13 = vector.load %arg14[%c0_10, %c0_11] : memref<16x144xf32, #tpu.memory_space<vmem>>, vector<16x144xf32>
    %c0_12 = arith.constant 0 : index
    %c0_13 = arith.constant 0 : index
    %14 = vector.load %arg4[%c0_12, %c0_13] : memref<144x128xf32, #tpu.memory_space<vmem>>, vector<144x128xf32>
    %cst_14 = arith.constant dense<0.000000e+00> : vector<16x128xf32>
    %15 = tpu.matmul %13, %14, %cst_14 {dimension_numbers = #tpu.dot_dimension_numbers<[1], [0], [0], [1], [0, 0, 1, 1], [], []>} : vector<16x144xf32>, vector<144x128xf32>, vector<16x128xf32> -> vector<16x128xf32>
    %c0_15 = arith.constant 0 : index
    %c0_16 = arith.constant 0 : index
    %16 = vector.load %arg5[%c0_15, %c0_16] : memref<16x128xf32, #tpu.memory_space<vmem>>, vector<16x128xf32>
    %17 = arith.mulf %15, %16 : vector<16x128xf32>
    %c0_17 = arith.constant 0 : index
    %c0_18 = arith.constant 0 : index
    %18 = vector.load %arg6[%c0_17, %c0_18] : memref<2x16xf32, #tpu.memory_space<vmem>>, vector<2x16xf32>
    %cst_19 = arith.constant dense<0.000000e+00> : vector<2x128xf32>
    %19 = tpu.matmul %18, %17, %cst_19 {dimension_numbers = #tpu.dot_dimension_numbers<[1], [0], [0], [1], [0, 0, 1, 1], [], []>} : vector<2x16xf32>, vector<16x128xf32>, vector<2x128xf32> -> vector<2x128xf32>
    %c0_20 = arith.constant 0 : index
    %c0_21 = arith.constant 0 : index
    %20 = vector.load %arg7[%c0_20, %c0_21] : memref<128x16xf32, #tpu.memory_space<vmem>>, vector<128x16xf32>
    %cst_22 = arith.constant dense<0.000000e+00> : vector<2x16xf32>
    %21 = tpu.matmul %19, %20, %cst_22 {dimension_numbers = #tpu.dot_dimension_numbers<[1], [0], [0], [1], [0, 0, 1, 1], [], []>} : vector<2x128xf32>, vector<128x16xf32>, vector<2x16xf32> -> vector<2x16xf32>
    %c0_23 = arith.constant 0 : index
    %c0_24 = arith.constant 0 : index
    %22 = vector.load %arg8[%c0_23, %c0_24] : memref<1x16xf32, #tpu.memory_space<vmem>>, vector<1x16xf32>
    %23 = vector.broadcast %22 : vector<1x16xf32> to vector<2x16xf32>
    %24 = arith.addf %21, %23 : vector<2x16xf32>
    %cst_25 = arith.constant 0.000000e+00 : f32
    %25 = vector.broadcast %cst_25 : f32 to vector<2x16xf32>
    %26 = arith.maximumf %24, %25 : vector<2x16xf32>
    %c0_26 = arith.constant 0 : index
    %c0_27 = arith.constant 0 : index
    %27 = vector.load %arg9[%c0_26, %c0_27] : memref<16x8xf32, #tpu.memory_space<vmem>>, vector<16x8xf32>
    %cst_28 = arith.constant dense<0.000000e+00> : vector<2x8xf32>
    %28 = tpu.matmul %26, %27, %cst_28 {dimension_numbers = #tpu.dot_dimension_numbers<[1], [0], [0], [1], [0, 0, 1, 1], [], []>} : vector<2x16xf32>, vector<16x8xf32>, vector<2x8xf32> -> vector<2x8xf32>
    %c0_29 = arith.constant 0 : index
    %c0_30 = arith.constant 0 : index
    %29 = vector.load %arg10[%c0_29, %c0_30] : memref<1x8xf32, #tpu.memory_space<vmem>>, vector<1x8xf32>
    %30 = vector.broadcast %29 : vector<1x8xf32> to vector<2x8xf32>
    %31 = arith.addf %28, %30 : vector<2x8xf32>
    %cst_31 = arith.constant 0.000000e+00 : f32
    %32 = vector.broadcast %cst_31 : f32 to vector<2x8xf32>
    %33 = arith.maximumf %31, %32 : vector<2x8xf32>
    %c0_32 = arith.constant 0 : index
    %c0_33 = arith.constant 0 : index
    %34 = vector.load %arg11[%c0_32, %c0_33] : memref<8x128xf32, #tpu.memory_space<vmem>>, vector<8x128xf32>
    %cst_34 = arith.constant dense<0.000000e+00> : vector<2x128xf32>
    %35 = tpu.matmul %33, %34, %cst_34 {dimension_numbers = #tpu.dot_dimension_numbers<[1], [0], [0], [1], [0, 0, 1, 1], [], []>} : vector<2x8xf32>, vector<8x128xf32>, vector<2x128xf32> -> vector<2x128xf32>
    %c0_35 = arith.constant 0 : index
    %c0_36 = arith.constant 0 : index
    %36 = vector.load %arg12[%c0_35, %c0_36] : memref<1x128xf32, #tpu.memory_space<vmem>>, vector<1x128xf32>
    %37 = vector.broadcast %36 : vector<1x128xf32> to vector<2x128xf32>
    %38 = arith.addf %35, %37 : vector<2x128xf32>
    %c0_37 = arith.constant 0 : index
    %c0_38 = arith.constant 0 : index
    %39 = vector.load %arg13[%c0_37, %c0_38] : memref<2x128xf32, #tpu.memory_space<vmem>>, vector<2x128xf32>
    tpu.vector_store %arg13[%c0_37, %c0_38], %38 {strides = array<i32>} : memref<2x128xf32, #tpu.memory_space<vmem>>, vector<2x128xf32>,
    return
  }
  func.func @transform_0(%arg0: i32) -> (i32, i32, i32) {
    %c0_i32 = arith.constant 0 : i32
    %c0_i32_0 = arith.constant 0 : i32
    %c0_i32_1 = arith.constant 0 : i32
    return %arg0, %c0_i32, %c0_i32_0 : i32, i32, i32
  }
  func.func @transform_1(%arg0: i32) -> (i32, i32) {
    %c0_i32 = arith.constant 0 : i32
    %c0_i32_0 = arith.constant 0 : i32
    %c0_i32_1 = arith.constant 0 : i32
    return %c0_i32, %c0_i32_0 : i32, i32
  }
  func.func @transform_2(%arg0: i32) -> (i32, i32) {
    %c0_i32 = arith.constant 0 : i32
    %c0_i32_0 = arith.constant 0 : i32
    %c0_i32_1 = arith.constant 0 : i32
    return %c0_i32, %c0_i32_0 : i32, i32
  }
  func.func @transform_3(%arg0: i32) -> (i32, i32) {
    %c0_i32 = arith.constant 0 : i32
    %c0_i32_0 = arith.constant 0 : i32
    %c0_i32_1 = arith.constant 0 : i32
    return %c0_i32, %c0_i32_0 : i32, i32
  }
  func.func @transform_4(%arg0: i32) -> (i32, i32) {
    %c0_i32 = arith.constant 0 : i32
    %c0_i32_0 = arith.constant 0 : i32
    %c0_i32_1 = arith.constant 0 : i32
    return %c0_i32, %c0_i32_0 : i32, i32
  }
  func.func @transform_5(%arg0: i32) -> (i32, i32) {
    %c0_i32 = arith.constant 0 : i32
    %c0_i32_0 = arith.constant 0 : i32
    %c0_i32_1 = arith.constant 0 : i32
    return %c0_i32, %c0_i32_0 : i32, i32
  }
  func.func @transform_6(%arg0: i32) -> (i32, i32) {
    %c0_i32 = arith.constant 0 : i32
    %c0_i32_0 = arith.constant 0 : i32
    %c0_i32_1 = arith.constant 0 : i32
    return %c0_i32, %c0_i32_0 : i32, i32
  }
  func.func @transform_7(%arg0: i32) -> (i32, i32) {
    %c0_i32 = arith.constant 0 : i32
    %c0_i32_0 = arith.constant 0 : i32
    %c0_i32_1 = arith.constant 0 : i32
    return %c0_i32, %c0_i32_0 : i32, i32
  }
  func.func @transform_8(%arg0: i32) -> (i32, i32) {
    %c0_i32 = arith.constant 0 : i32
    %c0_i32_0 = arith.constant 0 : i32
    %c0_i32_1 = arith.constant 0 : i32
    return %c0_i32, %c0_i32_0 : i32, i32
  }
  func.func @transform_9(%arg0: i32) -> (i32, i32) {
    %c0_i32 = arith.constant 0 : i32
    %c0_i32_0 = arith.constant 0 : i32
    %c0_i32_1 = arith.constant 0 : i32
    return %c0_i32, %c0_i32_0 : i32, i32
  }
  func.func @transform_10(%arg0: i32) -> (i32, i32) {
    %c0_i32 = arith.constant 0 : i32
    %c0_i32_0 = arith.constant 0 : i32
    %c0_i32_1 = arith.constant 0 : i32
    return %c0_i32, %c0_i32_0 : i32, i32
  }
  func.func @transform_11(%arg0: i32) -> (i32, i32) {
    %c0_i32 = arith.constant 0 : i32
    %c0_i32_0 = arith.constant 0 : i32
    %c0_i32_1 = arith.constant 0 : i32
    return %c0_i32, %c0_i32_0 : i32, i32
  }
  func.func @transform_12(%arg0: i32) -> (i32, i32) {
    %c0_i32 = arith.constant 0 : i32
    %c0_i32_0 = arith.constant 0 : i32
    return %arg0, %c0_i32 : i32, i32
  }
}

</mosaic_0001>

<bundles_post_ra>
// kernel: eq.13
= control target key start
LH: loop header
LB: loop body
LE: loop exit
PB: predicated region body
PF: predicated region fallthrough
CT: control target
= control target key end

     0   :  { %s69_s10 = smov 112   ;;  %s70_s11 = smov 80   ;;  %vm3_vm0 = vcmask 130048   ;;  %vm9_vm1 = vcmask 1048448   ;;  %vm15_vm2 = vcmask 917248   ;;  %vm21_vm3 = vcmask 786048   ;;  %s113_s0 = inlined_call_operand.vmem [shape: s32[8,16], index: 0, kind: input, shape index: {}]   ;;  %s114_s1 = inlined_call_operand.vmem [shape: s32[128], index: 1, kind: output, shape index: {}]  }
   0x1   :  { %v55_v0 = vld [vmem:[%s113_s0 + $0x7] sm:$0x1]   ;;  %v57_v1 = vld [vmem:[%s113_s0 + $0x5] sm:$0x1]   ;;  %v56_v2 = vld [vmem:[%s113_s0 + $0x6] sm:$0x1]  }
   0x2   :  { %7 = vrot.lane.b32.xlu0 %v55_v0, %s69_s10  ;;  %19 = vrot.lane.b32.xlu1 %v57_v1, %s70_s11  ;;  %v58_v3 = vld [vmem:[%s113_s0 + $0x4] sm:$0x1]   ;;  %v2_v4 = vld [vmem:[%s113_s0] sm:$0x1]   ;;  %s71_s18 = smov 96   ;;  %s72_s19 = smov 64  }
   0x3   :  { %4 = vst.msk [vmem:[#allocation0] sm:$0x1] %vm3_vm0, %v2_v4   ;;  %v59_v5 = vld [vmem:[%s113_s0 + $0x3] sm:$0x1]   ;;  %v60_v6 = vld [vmem:[%s113_s0 + $0x2] sm:$0x1]  }
   0x4   :  { %s73_s24 = smov 48   ;;  %s74_s25 = smov 32   ;;  %v61_v7 = vld [vmem:[%s113_s0 + $0x1] sm:$0x1]   ;;  %vm27_vm4 = vcmask 654848   ;;  %vm33_vm5 = vcmask 523648  }
   0x5   :  { %s75_s0 = smov 16   ;;  %vm39_vm6 = vcmask 392448   ;;  %vm45_vm7 = vcmask 261248  }
   0x6   :  { %13 = vrot.lane.b32.xlu0 %v56_v2, %s71_s18  ;;  %25 = vrot.lane.b32.xlu1 %v58_v3, %s72_s19 }
   0xa   :  { %31 = vrot.lane.b32.xlu0 %v59_v5, %s73_s24  ;;  %37 = vrot.lane.b32.xlu1 %v60_v6, %s74_s25 }
   0xe   :  { %43 = vrot.lane.b32.xlu0 %v61_v7, %s75_s0 }
  0x74   :  { %v8_v8 = vpop.permute.xlu0 %7   ;;  %v20_v9 = vpop.permute.xlu1 %19  }
  0x75   :  { %10 = vst.msk [vmem:[#allocation0] sm:$0x1] %vm9_vm1, %v8_v8  }
  0x78   :  { %v14_v10 = vpop.permute.xlu0 %13   ;;  %v26_v11 = vpop.permute.xlu1 %25  }
  0x79   :  { %16 = vst.msk [vmem:[#allocation0] sm:$0x1] %vm15_vm2, %v14_v10  }
  0x7a   :  { %22 = vst.msk [vmem:[#allocation0] sm:$0x1] %vm21_vm3, %v20_v9  }
  0x7b   :  { %28 = vst.msk [vmem:[#allocation0] sm:$0x1] %vm27_vm4, %v26_v11  }
  0x7c   :  { %v32_v12 = vpop.permute.xlu0 %31   ;;  %v38_v13 = vpop.permute.xlu1 %37  }
  0x7d   :  { %34 = vst.msk [vmem:[#allocation0] sm:$0x1] %vm33_vm5, %v32_v12  }
  0x7e   :  { %40 = vst.msk [vmem:[#allocation0] sm:$0x1] %vm39_vm6, %v38_v13  }
  0x80   :  { %v44_v14 = vpop.permute.xlu0 %43  }
  0x81   :  { %46 = vst.msk [vmem:[#allocation0] sm:$0x1] %vm45_vm7, %v44_v14  }
  0x88   :  { %v51_v15 = vld [vmem:[#allocation0] sm:$0x1] }
  0x89   :  { %54 = vst [vmem:[%s114_s1] sm:$0x1] %v51_v15 }

// kernel: eq.10
= control target key start
LH: loop header
LB: loop body
LE: loop exit
PB: predicated region body
PF: predicated region fallthrough
CT: control target
= control target key end

     0   :  { %vm8_vm0 = vcmask 64512   ;;  %vm14_vm1 = vcmask 130112   ;;  %s42_s0 = inlined_call_operand.vmem [shape: s32[2,8], index: 0, kind: input, shape index: {}]   ;;  %s43_s1 = inlined_call_operand.vmem [shape: s32[16], index: 1, kind: output, shape index: {}]  }
   0x1   :  { %v5_v0 = vld [vmem:[%s42_s0] sm:$0x3]  ;;  %s25_s0 = smov 8  }
   0x2   :  { %6 = vst [vmem:[#allocation1] sm:$0x3] %v5_v0 }
   0x9   :  { %v11_v1 = vld [vmem:[#allocation1 + $0x1] sm:$0x1]   ;;  %v7_v2 = vld [vmem:[#allocation1] sm:$0x1]  }
   0xa   :  { %12 = vrot.lane.b32.xlu0 %v11_v1, %s25_s0  ;;  %9 = vst.msk [vmem:[#allocation0] sm:$0x1] %vm8_vm0, %v7_v2  }
  0x7c   :  { %v13_v3 = vpop.permute.xlu0 %12  }
  0x7d   :  { %15 = vst.msk [vmem:[#allocation0] sm:$0x1] %vm14_vm1, %v13_v3  }
  0x84   :  { %v20_v4 = vld [vmem:[#allocation0] sm:$0x1] }
  0x85   :  { %23 = vst [vmem:[%s43_s1] sm:$0x1] %v20_v4 }

// kernel: convnet_forward.1
= control target key start
LH: loop header
LB: loop body
LE: loop exit
PB: predicated region body
PF: predicated region fallthrough
CT: control target
= control target key end

     0   :  { %v964_v1 = vmov 0.0   ;;  %vm965_vm0 = vmmov 0   ;;  %v966_v5 = vmov 0   ;;  %s1307_s0 = inlined_call_operand.vmem [shape: bf16[1,128,288], index: 0, kind: input, shape index: {}]   ;;  %s1308_s1 = inlined_call_operand.vmem [shape: bf16[8,128], index: 1, kind: input, shape index: {}]   ;;  %s1309_s2 = inlined_call_operand.vmem [shape: f32[8,1], index: 2, kind: input, shape index: {}]   ;;  %s1310_s3 = inlined_call_operand.vmem [shape: f32[144,128], index: 3, kind: input, shape index: {}]   ;;  %s1311_s4 = inlined_call_operand.vmem [shape: f32[16,128], index: 4, kind: input, shape index: {}]   ;;  %s1312_s5 = inlined_call_operand.vmem [shape: f32[2,16], index: 5, kind: input, shape index: {}]   ;;  %s1313_s6 = inlined_call_operand.vmem [shape: f32[128,16], index: 6, kind: input, shape index: {}]   ;;  %s1314_s7 = inlined_call_operand.vmem [shape: f32[1,16], index: 7, kind: input, shape index: {}]   ;;  %s1315_s8 = inlined_call_operand.vmem [shape: f32[16,8], index: 8, kind: input, shape index: {}]   ;;  %s1316_s9 = inlined_call_operand.vmem [shape: f32[1,8], index: 9, kind: input, shape index: {}]   ;;  %s1317_s10 = inlined_call_operand.vmem [shape: f32[8,128], index: 10, kind: input, shape index: {}]   ;;  %s1318_s11 = inlined_call_operand.vmem [shape: f32[1,128], index: 11, kind: input, shape index: {}]   ;;  %s1319_s12 = inlined_call_operand.hbm [shape: f32[2,128], index: 12, kind: output, shape index: {}]  }
   0x1   :  { %v910_v0 = vld [vmem:[%s1307_s0 + $0xac] ss:$12 sps:$4 sm:$0xff]   ;;  %830 = vmatprep.subr.bf16.mxu1 %v964_v1  ;;  %v912_v2 = vld [vmem:[%s1307_s0 + $0xb0] ss:$12 sps:$4 sm:$0xff]   ;;  %846 = vmatprep.mubr.msk.bf16.mxu1 %vm965_vm0, %v964_v1  ;;  %v913_v3 = vld [vmem:[%s1307_s0 + $0xa8] ss:$12 sps:$4 sm:$0xff]  }
   0x2   :  { %210 = vmatprep.subr.bf16.mxu0 %v910_v0  ;;  %831 = vmatpush3.bf16.msra.mxu1 %v912_v2  ;;  %v914_v4 = vld [vmem:[%s1307_s0 + $0x94] ss:$12 sps:$4 sm:$0xff]   ;;  %v916_v6 = vld [vmem:[%s1307_s0 + $0x98] ss:$12 sps:$4 sm:$0xff]   ;;  %v917_v7 = vld [vmem:[%s1307_s0 + $0x90] ss:$12 sps:$4 sm:$0xff]  }
   0x3   :  { %242 = vmatprep.mubr.bf16.mxu0 %v966_v5  ;;  %211 = vmatpush1.bf16.msra.mxu0 %v913_v3  ;;  %v918_v8 = vld [vmem:[%s1307_s0 + $0x7c] ss:$12 sps:$4 sm:$0xff]   ;;  %v920_v9 = vld [vmem:[%s1307_s0 + $0x80] ss:$12 sps:$4 sm:$0xff]   ;;  %v921_v10 = vld [vmem:[%s1307_s0 + $0x78] ss:$12 sps:$4 sm:$0xff]  }
   0x4   :  { %832 = vmatprep.subr.bf16.mxu1 %v964_v1  ;;  %212 = vmatprep.subr.bf16.mxu0 %v914_v4  ;;  %v922_v11 = vld [vmem:[%s1307_s0 + $0x64] ss:$12 sps:$4 sm:$0xff]   ;;  %v924_v12 = vld [vmem:[%s1307_s0 + $0x68] ss:$12 sps:$4 sm:$0xff]   ;;  %v925_v13 = vld [vmem:[%s1307_s0 + $0x60] ss:$12 sps:$4 sm:$0xff]  }
   0x5   :  { %909 = vset.pattern.permute.xlu0 %v966_v5  ;;  %v926_v14 = vld [vmem:[%s1307_s0 + $0x4c] ss:$12 sps:$4 sm:$0xff]   ;;  %v928_v15 = vld [vmem:[%s1307_s0 + $0x50] ss:$12 sps:$4 sm:$0xff]   ;;  %v929_v16 = vld [vmem:[%s1307_s0 + $0x48] ss:$12 sps:$4 sm:$0xff]  }
   0x6   :  { %833 = vmatpush3.bf16.msra.mxu1 %v916_v6  ;;  %v930_v17 = vld [vmem:[%s1307_s0 + $0x34] ss:$12 sps:$4 sm:$0xff]   ;;  %v932_v18 = vld [vmem:[%s1307_s0 + $0x38] ss:$12 sps:$4 sm:$0xff]   ;;  %v933_v20 = vld [vmem:[%s1307_s0 + $0x30] ss:$12 sps:$4 sm:$0xff]  }
   0x7   :  { %213 = vmatpush1.bf16.msra.mxu0 %v917_v7  ;;  %834 = vmatprep.subr.bf16.mxu1 %v964_v1  ;;  %v76_v19 = vld [vmem:[%s1309_s2] sm:$0xff]  ;;  %v934_v21 = vld [vmem:[%s1307_s0 + $0x1c] ss:$12 sps:$4 sm:$0xff]  }
   0x8   :  { %214 = vmatprep.subr.bf16.mxu0 %v918_v8  ;;  %79 = vperm.xlu0 %909, %v76_v19  }
   0xa   :  { %835 = vmatpush3.bf16.msra.mxu1 %v920_v9 }
   0xb   :  { %215 = vmatpush1.bf16.msra.mxu0 %v921_v10  ;;  %836 = vmatprep.subr.bf16.mxu1 %v964_v1 }
   0xc   :  { %216 = vmatprep.subr.bf16.mxu0 %v922_v11 }
   0xe   :  { %837 = vmatpush3.bf16.msra.mxu1 %v924_v12 }
   0xf   :  { %217 = vmatpush1.bf16.msra.mxu0 %v925_v13  ;;  %838 = vmatprep.subr.bf16.mxu1 %v964_v1 }
  0x10   :  { %218 = vmatprep.subr.bf16.mxu0 %v926_v14 }
  0x12   :  { %839 = vmatpush3.bf16.msra.mxu1 %v928_v15 }
  0x13   :  { %219 = vmatpush1.bf16.msra.mxu0 %v929_v16  ;;  %840 = vmatprep.subr.bf16.mxu1 %v964_v1 }
  0x14   :  { %220 = vmatprep.subr.bf16.mxu0 %v930_v17 }
  0x15   :  { %17 = vsyncpa [#allocation4], 0  ;;  %v936_v22 = vld [vmem:[%s1307_s0 + $0x20] ss:$12 sps:$4 sm:$0xff]   ;;  %v937_v23 = vld [vmem:[%s1307_s0 + $0x18] ss:$12 sps:$4 sm:$0xff]  }
  0x16   :  { %841 = vmatpush3.bf16.msra.mxu1 %v932_v18  ;;  %v938_v24 = vld [vmem:[%s1307_s0 + $0x4] ss:$12 sps:$4 sm:$0xff]   ;;  %v940_v25 = vld [vmem:[%s1307_s0 + $0x8] ss:$12 sps:$4 sm:$0xff]   ;;  %v941_v26 = vld [vmem:[%s1307_s0] ss:$12 sps:$4 sm:$0xff]  }
  0x17   :  { %221 = vmatpush1.bf16.msra.mxu0 %v933_v20  ;;  %842 = vmatprep.subr.bf16.mxu1 %v964_v1  ;;  %v43_v27 = vld [vmem:[%s1308_s1] sm:$0xf]  ;;  %v328_v28 = vld [vmem:[%s1310_s3 + $0x78] sm:$0xff]  ;;  %v327_v29 = vld [vmem:[%s1310_s3 + $0x70] sm:$0xff]  ;;  %vm295_vm1 = vcmask 130048   ;;  %vm303_vm2 = vcmask 916480  }
  0x18   :  { %222 = vmatprep.subr.bf16.mxu0 %v934_v21  ;;  %v326_v30 = vld [vmem:[%s1310_s3 + $0x68] sm:$0xff]  ;;  %v325_v31 = vld [vmem:[%s1310_s3 + $0x60] sm:$0xff]  ;;  %v324_v32 = vld [vmem:[%s1310_s3 + $0x58] sm:$0xff]  ;;  %vm675_vm3 = vcmask 64512  }
  0x19   :  { %v323_v33 = vld [vmem:[%s1310_s3 + $0x50] sm:$0xff]  ;;  %v322_v34 = vld [vmem:[%s1310_s3 + $0x48] sm:$0xff]  ;;  %v321_v35 = vld [vmem:[%s1310_s3 + $0x40] sm:$0xff] }
  0x1a   :  { %843 = vmatpush3.bf16.msra.mxu1 %v936_v22  ;;  %v320_v36 = vld [vmem:[%s1310_s3 + $0x38] sm:$0xff]  ;;  %v319_v37 = vld [vmem:[%s1310_s3 + $0x30] sm:$0xff]  ;;  %v318_v38 = vld [vmem:[%s1310_s3 + $0x28] sm:$0xff] }
  0x1b   :  { %223 = vmatpush1.bf16.msra.mxu0 %v937_v23  ;;  %844 = vmatprep.subr.bf16.mxu1 %v964_v1  ;;  %v317_v39 = vld [vmem:[%s1310_s3 + $0x20] sm:$0xff]  ;;  %v316_v40 = vld [vmem:[%s1310_s3 + $0x18] sm:$0xff]  ;;  %v315_v41 = vld [vmem:[%s1310_s3 + $0x10] sm:$0xff] }
  0x1c   :  { %224 = vmatprep.subr.bf16.mxu0 %v938_v24  ;;  %v314_v42 = vld [vmem:[%s1310_s3 + $0x8] sm:$0xff]  ;;  %v313_v43 = vld [vmem:[%s1310_s3] sm:$0xff]  ;;  %v505_v12 = vld [vmem:[%s1313_s6 + $0x78] sm:$0xff] }
  0x1d   :  { %v330_v44 = vld [vmem:[%s1310_s3 + $0x88] sm:$0xff]  ;;  %v329_v45 = vld [vmem:[%s1310_s3 + $0x80] sm:$0xff]  ;;  %s967_s3 = smov 112   ;;  %v504_v13 = vld [vmem:[%s1313_s6 + $0x70] sm:$0xff] }
  0x1e   :  { %845 = vmatpush3.bf16.msra.mxu1 %v940_v25  ;;  %v413_v5 = vld [vmem:[%s1311_s4 + $0x8] sm:$0xff]  ;;  %v412_v6 = vld [vmem:[%s1311_s4] sm:$0xff]  ;;  %v501_v16 = vld [vmem:[%s1313_s6 + $0x58] sm:$0xff] }
  0x1f   :  { %225 = vmatpush1.bf16.msra.mxu0 %v941_v26  ;;  %850 = vmatprep.subr.mxu1 %v964_v1  ;;  %v416_v11 = vld [vmem:[%s1312_s5] sm:$0x3]  ;;  %v503_v14 = vld [vmem:[%s1313_s6 + $0x68] sm:$0xff]  ;;  %v500_v17 = vld [vmem:[%s1313_s6 + $0x50] sm:$0xff] }
  0x20   :  { %337 = vmatprep.subr.mxu0 %v964_v1  ;;  %v502_v15 = vld [vmem:[%s1313_s6 + $0x60] sm:$0xff]  ;;  %v499_v18 = vld [vmem:[%s1313_s6 + $0x48] sm:$0xff]  ;;  %v497_v20 = vld [vmem:[%s1313_s6 + $0x38] sm:$0xff] }
  0x21   :  { %847 = vmatmul.mubr.bf16.vlgmr.msra.gmra.mxu1 %v43_v27  ;;  %v498_v19 = vld [vmem:[%s1313_s6 + $0x40] sm:$0xff]  ;;  %v496_v21 = vld [vmem:[%s1313_s6 + $0x30] sm:$0xff]  ;;  %v495_v22 = vld [vmem:[%s1313_s6 + $0x28] sm:$0xff] }
  0x22   :  { %243 = vmatmul.mubr.bf16.vlgmr.msra.gmra.mxu0 %v43_v27  ;;  %854 = vmatprep.mubr.msk.f32.mxu1 %vm965_vm0, %v964_v1  ;;  %v494_v23 = vld [vmem:[%s1313_s6 + $0x20] sm:$0xff]  ;;  %v493_v24 = vld [vmem:[%s1313_s6 + $0x18] sm:$0xff]  ;;  %v492_v25 = vld [vmem:[%s1313_s6 + $0x10] sm:$0xff] }
  0x23   :  { %338 = vmatpush1.msra.mxu0 %v328_v28  ;;  %v491_v26 = vld [vmem:[%s1313_s6 + $0x8] sm:$0xff]  ;;  %v490_v27 = vld [vmem:[%s1313_s6] sm:$0xff] }
  0x24   :  { %339 = vmatprep.subr.mxu0 %v964_v1  ;;  %v585_v28 = vld [vmem:[%s1315_s8 + $0x8] sm:$0xff] }
  0x25   :  { %340 = vmatpush1.msra.mxu0 %v327_v29 }
  0x26   :  { %341 = vmatprep.subr.mxu0 %v964_v1 }
  0x27   :  { %342 = vmatpush1.msra.mxu0 %v326_v30 }
  0x28   :  { %343 = vmatprep.subr.mxu0 %v964_v1 }
  0x29   :  { %344 = vmatpush1.msra.mxu0 %v325_v31  ;;  %v584_v31 = vld [vmem:[%s1315_s8] sm:$0xff] }
  0x2a   :  { %345 = vmatprep.subr.mxu0 %v964_v1 }
  0x2b   :  { %346 = vmatpush1.msra.mxu0 %v324_v32  ;;  %v791_v32 = vld [vmem:[%s1314_s7] ss:$0 sm:$0xff] }
  0x2c   :  { %347 = vmatprep.subr.mxu0 %v964_v1 }
  0x2d   :  { %348 = vmatpush1.msra.mxu0 %v323_v33 }
  0x2e   :  { %349 = vmatprep.subr.mxu0 %v964_v1 }
  0x2f   :  { %350 = vmatpush1.msra.mxu0 %v322_v34 }
  0x30   :  { %351 = vmatprep.subr.mxu0 %v964_v1 }
  0x31   :  { %352 = vmatpush1.msra.mxu0 %v321_v35 }
  0x32   :  { %353 = vmatprep.subr.mxu0 %v964_v1 }
  0x33   :  { %354 = vmatpush1.msra.mxu0 %v320_v36 }
  0x34   :  { %355 = vmatprep.subr.mxu0 %v964_v1 }
  0x35   :  { %356 = vmatpush1.msra.mxu0 %v319_v37  ;;  %v667_v37 = vld [vmem:[%s1317_s10] sm:$0xff] }
  0x36   :  { %357 = vmatprep.subr.mxu0 %v964_v1 }
  0x37   :  { %358 = vmatpush1.msra.mxu0 %v318_v38 }
  0x38   :  { %359 = vmatprep.subr.mxu0 %v964_v1 }
  0x39   :  { %360 = vmatpush1.msra.mxu0 %v317_v39 }
  0x3a   :  { %361 = vmatprep.subr.mxu0 %v964_v1 }
  0x3b   :  { %362 = vmatpush1.msra.mxu0 %v316_v40 }
  0x3c   :  { %363 = vmatprep.subr.mxu0 %v964_v1 }
  0x3d   :  { %364 = vmatpush1.msra.mxu0 %v315_v41 }
  0x3e   :  { %365 = vmatprep.subr.mxu0 %v964_v1 }
  0x3f   :  { %366 = vmatpush1.msra.mxu0 %v314_v42  ;;  %v794_v42 = vld [vmem:[%s1318_s11] ss:$0 sm:$0xff] }
  0x40   :  { %367 = vmatprep.subr.mxu0 %v964_v1 }
  0x41   :  { %368 = vmatpush1.msra.mxu0 %v313_v43 }
  0x42   :  { %397 = vmatprep.subr.mxu0 %v964_v1 }
  0x43   :  { %398 = vmatpush2.msra.mxu0 %v330_v44 }
  0x44   :  { %399 = vmatprep.subr.mxu0 %v964_v1 }
  0x45   :  { %400 = vmatpush2.msra.mxu0 %v329_v45 }
  0x46   :  { %892 = vmatprep.subr.mxu0 %v964_v1 }
  0x83   :  { %v80_v46 = vpop.permute.xlu0 %79 }
  0xe1   :  { %v285_v47 = vpop.f32.mrf.mxu1 }
  0xe2   :  { %v244_v48 = vpop.f32.mrf.mxu0  ;;  %v286_v49 = vadd.f32 %v285_v47, %v80_v46 }
  0xe3   :  { %v245_v50 = vadd.f32 %v244_v48, %v80_v46  ;;  %v848_v51 = vpop.f32.mrf.mxu1 }
  0xe4   :  { %v246_v52 = vpop.f32.mrf.mxu0  ;;  %v293_v53 = vmax.f32 %v286_v49, 0.0 }
  0xe5   :  { %v291_v54 = vmax.f32 %v245_v50, 0.0  ;;  %v247_v55 = vadd.f32 %v246_v52, %v80_v46  ;;  %v288_v56 = vpop.f32.mrf.mxu1 }
  0xe6   :  { %v248_v57 = vpop.f32.mrf.mxu0  ;;  %301 = vrot.lane.b32.xlu1 %v293_v53, %s967_s3 }
  0xe7   :  { %v292_v58 = vmax.f32 %v247_v55, 0.0  ;;  %v849_v59 = vpop.f32.mrf.mxu1 }
  0xe8   :  { %v249_v60 = vpop.f32.mrf.mxu0 }
  0xe9   :  { %296 = vst.msk [vmem:[#allocation2 + $0x8] sm:$0xff] %vm295_vm1, %v292_v58  ;;  %299 = vrot.lane.b32.xlu0 %v292_v58, %s967_s3  ;;  %s968_s3 = smov [#allocation3]  }
  0xea   :  { %s756_s30 = sshll.u32 %s968_s3, 4  ;;  %s757_s30 = int_to_ptr.vmem [resolvable:$true] %s756_s30 }
  0xeb   :  { %s942_s10 = scalar_lea.vmem %s757_s30, 32  ;;  %p947_p1 = scmp.lt.s32.totalorder %s757_s30, %s757_s30 }
  0xec   :  { %p943_p0 = scmp.ne.s32.totalorder %s757_s30, %s942_s10  ;;  %p948_p2 = scmp.lt.s32.totalorder %s942_s10, %s942_s10 }
  0xee   :  { %p949_p3 = por %p948_p2, %p947_p1 }
  0xf0   :  { %v310_v61 = vld [vmem:[#allocation2 + $0x8] sm:$0xff]  ;;  %p950_p4 = pnand %p949_p3, %p943_p0 }
  0xf1   :  { %788 = vmatprep.mubr.msk.f32.mxu0 %vm295_vm1, %v310_v61 }
  0xf2   :  { %402 = vmatmul.mubr.f32.vlgmr.msra.gmra.mxu0 %v291_v54 }
  0xf3   :  { %893 = vmatpush3.msra.mxu0 %v585_v28 }
  0xf4   :  { %894 = vmatprep.subr.mxu0 %v964_v1 }
  0xf5   :  { %895 = vmatpush3.msra.mxu0 %v584_v31 }
 0x158   :  { %v302_v62 = vpop.permute.xlu1 %301 }
 0x159   :  { %308 = vst.msk [vmem:[#allocation2 + $0x18] sm:$0xff] %vm295_vm1, %v302_v62 }
 0x15b   :  { %v300_v63 = vpop.permute.xlu0 %299 }
 0x15c   :  { %v304_v0 = vsel %vm303_vm2, %v300_v63, %v302_v62 }
 0x160   :  { %v312_v2 = vld [vmem:[#allocation2 + $0x18] sm:$0xff] }
 0x161   :  { %789 = vmatprep.mubr.msk.f32.mxu0 %vm295_vm1, %v312_v2 }
 0x162   :  { %407 = vmatmul.mubr.f32.gmra.mxu0 %v304_v0 }
 0x163   :  { %896 = vmatprep.mubr.msk.f32.mxu0 %vm965_vm0, %v964_v1 }
 0x1b2   :  { %v403_v3 = vpop.f32.mrf.mxu0 }
 0x1b3   :  { %v414_v10 = vmul.f32 %v412_v6, %v403_v3 }
 0x1b4   :  { %v405_v4 = vpop.f32.mrf.mxu0 }
 0x222   :  { %v408_v7 = vpop.f32.mrf.mxu0 }
 0x223   :  { %v415_v8 = vmul.f32 %v413_v5, %v408_v7 }
 0x224   :  { %v410_v9 = vpop.f32.mrf.mxu0 }
 0x225   :  { %851 = vmatpush3.msra.mxu1 %v415_v8 }
 0x226   :  { %852 = vmatprep.subr.mxu1 %v964_v1 }
 0x227   :  { %853 = vmatpush3.msra.mxu1 %v414_v10 }
 0x228   :  { %855 = vmatmul.mubr.msk.f32.vlgmr.msra.gmra.mxu1 %vm295_vm1, %v416_v11  ;;  %857 = vmatprep.subr.mxu1 %v964_v1 }
 0x229   :  { %858 = vmatpush3.msra.mxu1 %v505_v12  ;;  %889 = vmatprep.mubr.msk.f32.mxu1 %vm965_vm0, %v964_v1 }
 0x22a   :  { %859 = vmatprep.subr.mxu1 %v964_v1 }
 0x22b   :  { %860 = vmatpush3.msra.mxu1 %v504_v13 }
 0x22c   :  { %861 = vmatprep.subr.mxu1 %v964_v1 }
 0x22d   :  { %862 = vmatpush3.msra.mxu1 %v503_v14 }
 0x22e   :  { %863 = vmatprep.subr.mxu1 %v964_v1 }
 0x22f   :  { %864 = vmatpush3.msra.mxu1 %v502_v15 }
 0x230   :  { %865 = vmatprep.subr.mxu1 %v964_v1 }
 0x231   :  { %866 = vmatpush3.msra.mxu1 %v501_v16 }
 0x232   :  { %867 = vmatprep.subr.mxu1 %v964_v1 }
 0x233   :  { %868 = vmatpush3.msra.mxu1 %v500_v17 }
 0x234   :  { %869 = vmatprep.subr.mxu1 %v964_v1 }
 0x235   :  { %870 = vmatpush3.msra.mxu1 %v499_v18 }
 0x236   :  { %871 = vmatprep.subr.mxu1 %v964_v1 }
 0x237   :  { %872 = vmatpush3.msra.mxu1 %v498_v19 }
 0x238   :  { %873 = vmatprep.subr.mxu1 %v964_v1 }
 0x239   :  { %874 = vmatpush3.msra.mxu1 %v497_v20 }
 0x23a   :  { %875 = vmatprep.subr.mxu1 %v964_v1 }
 0x23b   :  { %876 = vmatpush3.msra.mxu1 %v496_v21 }
 0x23c   :  { %877 = vmatprep.subr.mxu1 %v964_v1 }
 0x23d   :  { %878 = vmatpush3.msra.mxu1 %v495_v22 }
 0x23e   :  { %879 = vmatprep.subr.mxu1 %v964_v1 }
 0x23f   :  { %880 = vmatpush3.msra.mxu1 %v494_v23 }
 0x240   :  { %881 = vmatprep.subr.mxu1 %v964_v1 }
 0x241   :  { %882 = vmatpush3.msra.mxu1 %v493_v24 }
 0x242   :  { %883 = vmatprep.subr.mxu1 %v964_v1 }
 0x243   :  { %884 = vmatpush3.msra.mxu1 %v492_v25 }
 0x244   :  { %885 = vmatprep.subr.mxu1 %v964_v1 }
 0x245   :  { %886 = vmatpush3.msra.mxu1 %v491_v26 }
 0x246   :  { %887 = vmatprep.subr.mxu1 %v964_v1 }
 0x247   :  { %888 = vmatpush3.msra.mxu1 %v490_v27 }
 0x248   :  { %899 = vmatprep.subr.mxu1 %v964_v1 }
 0x2e8   :  { %v486_v29 = vpop.f32.mrf.mxu1 }
 0x2e9   :  { %890 = vmatmul.mubr.f32.vlgmr.msra.gmra.mxu1 %v486_v29 }
 0x2ea   :  { %v856_v30 = vpop.f32.mrf.mxu1  ;;  %901 = vmatprep.mubr.msk.f32.mxu1 %vm965_vm0, %v964_v1  ;;  %900 = vmatpush3.msra.mxu1 %v667_v37  ;;  %v792_v1 = vld [vmem:[%s1316_s9] ss:$0 sm:$0xff] }
 0x3a9   :  { %v579_v33 = vpop.f32.mrf.mxu1 }
 0x3aa   :  { %v580_v34 = vadd.f32 %v791_v32, %v579_v33 }
 0x3ab   :  { %v891_v35 = vpop.f32.mrf.mxu1 }
 0x3ac   :  { %v583_v36 = vmax.f32 %v580_v34, 0.0 }
 0x3ae   :  { %897 = vmatmul.mubr.msk.f32.vlgmr.msra.gmra.mxu0 %vm295_vm1, %v583_v36 }
 0x46e   :  { %v662_v38 = vpop.f32.mrf.mxu0 }
 0x46f   :  { %v663_v39 = vadd.f32 %v792_v1, %v662_v38 }
 0x470   :  { %v898_v40 = vpop.f32.mrf.mxu0 }
 0x471   :  { %v666_v41 = vmax.f32 %v663_v39, 0.0 }
 0x473   :  { %902 = vmatmul.mubr.msk.f32.vlgmr.msra.gmra.mxu1 %vm675_vm3, %v666_v41 }
 0x533   :  { %v745_v43 = vpop.f32.mrf.mxu1 }
 0x534   :  { %v746_v44 = vadd.f32 %v794_v42, %v745_v43 }
 0x535   :  { %v903_v45 = vpop.f32.mrf.mxu1 }
 0x536   :  { %749 = vst [vmem:[#allocation3] sm:$0x3] %v746_v44 }
 0x537   :  { %953 = shalt.err (!%p950_p4)
}
 0x538   :  { %759 = dma.vmem_to_hbm [thread:$0]  %s757_s30, 32, %s1319_s12, [#allocation4]  }
 0x539   :  { %962 = dma.done.wait [#allocation4], 32  }
 0x53a   :  { %963 = vsyncadd [#allocation4], 4294967264 }
 0x53b   :  { %763 = vsyncpa [#allocation4], 1 }

</bundles_post_ra>
